<compile_context>
chip_gen: v7x
topology: tpu7x:2x2x1
jax: 0.10.0
libtpu: 0.0.40
codegen_flags: <defaults>
</compile_context>

<pallas_src>
import numpy as np
import jax
import jax.numpy as jnp
from jax.experimental import pallas as pl
from jax.experimental.pallas import tpu as pltpu


def make_bilinear_matrix(n: int) -> np.ndarray:
    """(2n, n) interpolation matrix matching PyTorch Upsample(scale=2, bilinear,
    align_corners=False): half-pixel sampling, edge-clamped."""
    out = np.zeros((2 * n, n), dtype=np.float32)
    for i in range(2 * n):
        src = (i + 0.5) / 2.0 - 0.5
        i0 = int(np.floor(src))
        w1 = src - i0
        i0c = min(max(i0, 0), n - 1)
        i1c = min(max(i0 + 1, 0), n - 1)
        out[i, i0c] += 1.0 - w1
        out[i, i1c] += w1
    return out


def build_upsample_plan(C: int, H: int, W: int, weights, op_dtype=jnp.bfloat16):
    """One-time (hoisted) construction of the per-stage constant operators.

    Per stage, on the transposed plane stack T = S^T with shape (w, c*h):
        T_out = A_w @ T @ L^T,     L = kron(W_conv, A_h)
    A_w : (2w, w)           width x2 interpolation
    L^T : (c*h, co*2h)      1x1 conv (channel mix) fused with height x2 interp
    """
    ops, specs = [], []
    c, h, w = C, H, W
    for wmat in weights:
        co = int(wmat.shape[0])
        ah = make_bilinear_matrix(h)                                   # (2h, h)
        aw = make_bilinear_matrix(w)                                   # (2w, w)
        l_t = np.kron(np.asarray(wmat, np.float32), ah).T              # (c*h, co*2h)
        ops.append(jnp.asarray(aw, dtype=op_dtype))
        ops.append(jnp.asarray(l_t, dtype=op_dtype))
        # Constant operators: same block every grid step (grid-invariant).
        specs.append(pl.BlockSpec((2 * w, w), lambda n: (0, 0)))
        specs.append(pl.BlockSpec((c * h, co * 2 * h), lambda n: (0, 0)))
        c, h, w = co, 2 * h, 2 * w
    return {
        "ops": ops,
        "specs": specs,
        "n_stages": len(weights),
        "out_c": c,
        "out_h": h,
        "out_w": w,
    }


def _make_fused_kernel(n_stages: int):
    def kernel(*refs):
        x_ref = refs[0]
        op_refs = refs[1:1 + 2 * n_stages]
        o_ref = refs[1 + 2 * n_stages]

        # t: transposed plane stack (w, c*h) for this batch element; lane dim = c*h.
        t = x_ref[0].astype(jnp.bfloat16)
        for i in range(n_stages):
            aw = op_refs[2 * i][...]        # (2w, w)      bf16
            l_t = op_refs[2 * i + 1][...]   # (c*h, co*2h) bf16
            # width x2 interp, then (1x1 conv + height x2 interp) -- both on MXU,
            # bf16 operands, f32 accumulation.
            u = jnp.dot(aw, t, preferred_element_type=jnp.float32)       # (2w, c*h)
            t = jnp.dot(u.astype(jnp.bfloat16), l_t,
                        preferred_element_type=jnp.float32)              # (2w, co*2h)
            if i + 1 < n_stages:
                t = t.astype(jnp.bfloat16)
        o_ref[0] = t.astype(o_ref.dtype)

    return kernel


def upsample_forward(x, plan):
    """UpSample.forward: all ResidualUpSample stages fused into one pallas_call.

    x:    (N, C, H, W) float32
    plan: output of build_upsample_plan (constant operators, built once).
    """
    N, C, H, W = x.shape
    n_stages = plan["n_stages"]
    co, ho, wo = plan["out_c"], plan["out_h"], plan["out_w"]

    # Lane-dense layout while W < 128: per batch element the kernel sees the
    # transposed plane stack (W, C*H) so the last (lane) dim is C*H (=128 here).
    x_t = x.transpose(0, 3, 1, 2).reshape(N, W, C * H)

    out = pl.pallas_call(
        _make_fused_kernel(n_stages),
        out_shape=jax.ShapeDtypeStruct((N, wo, co * ho), x.dtype),
        grid=(N,),
        in_specs=[pl.BlockSpec((1, W, C * H), lambda n: (n, 0, 0))] + plan["specs"],
        out_specs=pl.BlockSpec((1, wo, co * ho), lambda n: (n, 0, 0)),
        compiler_params=pltpu.CompilerParams(
            dimension_semantics=("parallel",),
            vmem_limit_bytes=32 * 1024 * 1024,
        ),
    )(x_t, *plan["ops"])

    # (N, 4W, Co*4H) -> (N, Co, 4H, 4W)
    return out.reshape(N, wo, co, ho).transpose(0, 2, 3, 1)


def upsample_reference(x, weights):
    """Pure-JAX f32 reference (PyTorch bilinear align_corners=False + 1x1 conv)."""
    for w in weights:
        N, C, H, W = x.shape
        up = jax.image.resize(x, (N, C, 2 * H, 2 * W), method="bilinear")
        x = jnp.einsum("oc,nchw->nohw", w, up)
    return x


if __name__ == "__main__":
    # Module config: in_channels=8, scale_factor=4 -> 2 stages (8 -> 4 -> 2 channels)
    in_channels = 8
    scale_factor = 4
    n_stages = int(np.log2(scale_factor))

    key = jax.random.PRNGKey(0)
    kx, *kw = jax.random.split(key, 1 + n_stages)

    N, H, W = 2, 16, 16
    x = jax.random.normal(kx, (N, in_channels, H, W), dtype=jnp.float32)

    # Deterministic 1x1 conv weights (out, in); PyTorch shape is (out, in, 1, 1).
    weights = []
    ch = in_channels
    for i in range(n_stages):
        co = ch // 2
        weights.append(0.1 * jax.random.normal(kw[i], (co, ch), dtype=jnp.float32))
        ch = co

    # Operator construction hoisted out of the per-call path (built once).
    plan = build_upsample_plan(in_channels, H, W, weights)

    out = jax.block_until_ready(upsample_forward(x, plan))

    ref = upsample_reference(x, weights)
    assert out.shape == (N, in_channels // scale_factor,
                         H * scale_factor, W * scale_factor)
    # bf16 MXU operands over two chained stages -> relaxed vs. the f32 reference.
    np.testing.assert_allclose(np.asarray(out), np.asarray(ref), rtol=2e-2, atol=2e-3)

    print("KERNEL_OK")
</pallas_src>

<mosaic_0001>
module attributes {stable_mosaic.version = 11 : i64} {
  func.func @kernel(%arg0: i32, %arg1: memref<1x16x128xf32, #tpu.memory_space<vmem>>, %arg2: memref<32x16xbf16, #tpu.memory_space<vmem>>, %arg3: memref<128x128xbf16, #tpu.memory_space<vmem>>, %arg4: memref<64x32xbf16, #tpu.memory_space<vmem>>, %arg5: memref<128x128xbf16, #tpu.memory_space<vmem>>, %arg6: memref<1x64x128xf32, #tpu.memory_space<vmem>>) attributes {dimension_semantics = [#tpu.dimension_semantics<parallel>], iteration_bounds = array<i64: 2>, scalar_prefetch = 0 : i64, scratch_operands = 0 : i64, tpu.core_type = #tpu.core_type<tc>, window_params = [{transform_indices = @transform_0, window_bounds = array<i64: 1, 16, 128>}, {pipeline_mode = #tpu.pipeline_mode<synchronous>, transform_indices = @transform_1, window_bounds = array<i64: 32, 16>}, {pipeline_mode = #tpu.pipeline_mode<synchronous>, transform_indices = @transform_2, window_bounds = array<i64: 128, 128>}, {pipeline_mode = #tpu.pipeline_mode<synchronous>, transform_indices = @transform_3, window_bounds = array<i64: 64, 32>}, {pipeline_mode = #tpu.pipeline_mode<synchronous>, transform_indices = @transform_4, window_bounds = array<i64: 128, 128>}, {transform_indices = @transform_5, window_bounds = array<i64: 1, 64, 128>}]} {
    %c0 = arith.constant 0 : index
    %c0_0 = arith.constant 0 : index
    %c0_1 = arith.constant 0 : index
    %0 = vector.load %arg1[%c0, %c0_0, %c0_1] : memref<1x16x128xf32, #tpu.memory_space<vmem>>, vector<1x16x128xf32>
    %1 = vector.shape_cast %0 : vector<1x16x128xf32> to vector<16x128xf32>
    %2 = arith.truncf %1 : vector<16x128xf32> to vector<16x128xbf16>
    %c0_2 = arith.constant 0 : index
    %c0_3 = arith.constant 0 : index
    %3 = vector.load %arg2[%c0_2, %c0_3] : memref<32x16xbf16, #tpu.memory_space<vmem>>, vector<32x16xbf16>
    %c0_4 = arith.constant 0 : index
    %c0_5 = arith.constant 0 : index
    %4 = vector.load %arg3[%c0_4, %c0_5] : memref<128x128xbf16, #tpu.memory_space<vmem>>, vector<128x128xbf16>
    %cst = arith.constant dense<0.000000e+00> : vector<32x128xf32>
    %5 = tpu.matmul %3, %2, %cst {dimension_numbers = #tpu.dot_dimension_numbers<[1], [0], [0], [1], [0, 0, 1, 1], [], []>} : vector<32x16xbf16>, vector<16x128xbf16>, vector<32x128xf32> -> vector<32x128xf32>
    %6 = arith.truncf %5 : vector<32x128xf32> to vector<32x128xbf16>
    %cst_6 = arith.constant dense<0.000000e+00> : vector<32x128xf32>
    %7 = tpu.matmul %6, %4, %cst_6 {dimension_numbers = #tpu.dot_dimension_numbers<[1], [0], [0], [1], [0, 0, 1, 1], [], []>} : vector<32x128xbf16>, vector<128x128xbf16>, vector<32x128xf32> -> vector<32x128xf32>
    %8 = arith.truncf %7 : vector<32x128xf32> to vector<32x128xbf16>
    %c0_7 = arith.constant 0 : index
    %c0_8 = arith.constant 0 : index
    %9 = vector.load %arg4[%c0_7, %c0_8] : memref<64x32xbf16, #tpu.memory_space<vmem>>, vector<64x32xbf16>
    %c0_9 = arith.constant 0 : index
    %c0_10 = arith.constant 0 : index
    %10 = vector.load %arg5[%c0_9, %c0_10] : memref<128x128xbf16, #tpu.memory_space<vmem>>, vector<128x128xbf16>
    %cst_11 = arith.constant dense<0.000000e+00> : vector<64x128xf32>
    %11 = tpu.matmul %9, %8, %cst_11 {dimension_numbers = #tpu.dot_dimension_numbers<[1], [0], [0], [1], [0, 0, 1, 1], [], []>} : vector<64x32xbf16>, vector<32x128xbf16>, vector<64x128xf32> -> vector<64x128xf32>
    %12 = arith.truncf %11 : vector<64x128xf32> to vector<64x128xbf16>
    %cst_12 = arith.constant dense<0.000000e+00> : vector<64x128xf32>
    %13 = tpu.matmul %12, %10, %cst_12 {dimension_numbers = #tpu.dot_dimension_numbers<[1], [0], [0], [1], [0, 0, 1, 1], [], []>} : vector<64x128xbf16>, vector<128x128xbf16>, vector<64x128xf32> -> vector<64x128xf32>
    %c0_13 = arith.constant 0 : index
    %c0_14 = arith.constant 0 : index
    %c0_15 = arith.constant 0 : index
    %14 = vector.load %arg6[%c0_13, %c0_14, %c0_15] : memref<1x64x128xf32, #tpu.memory_space<vmem>>, vector<1x64x128xf32>
    %15 = vector.shape_cast %14 : vector<1x64x128xf32> to vector<64x128xf32>
    %16 = vector.shape_cast %13 : vector<64x128xf32> to vector<1x64x128xf32>
    tpu.vector_store %arg6[%c0_13, %c0_14, %c0_15], %16 {strides = array<i32>} : memref<1x64x128xf32, #tpu.memory_space<vmem>>, vector<1x64x128xf32>,
    return
  }
  func.func @transform_0(%arg0: i32) -> (i32, i32, i32) {
    %c0_i32 = arith.constant 0 : i32
    %c0_i32_0 = arith.constant 0 : i32
    %c0_i32_1 = arith.constant 0 : i32
    return %arg0, %c0_i32, %c0_i32_0 : i32, i32, i32
  }
  func.func @transform_1(%arg0: i32) -> (i32, i32) {
    %c0_i32 = arith.constant 0 : i32
    %c0_i32_0 = arith.constant 0 : i32
    %c0_i32_1 = arith.constant 0 : i32
    return %c0_i32, %c0_i32_0 : i32, i32
  }
  func.func @transform_2(%arg0: i32) -> (i32, i32) {
    %c0_i32 = arith.constant 0 : i32
    %c0_i32_0 = arith.constant 0 : i32
    %c0_i32_1 = arith.constant 0 : i32
    return %c0_i32, %c0_i32_0 : i32, i32
  }
  func.func @transform_3(%arg0: i32) -> (i32, i32) {
    %c0_i32 = arith.constant 0 : i32
    %c0_i32_0 = arith.constant 0 : i32
    %c0_i32_1 = arith.constant 0 : i32
    return %c0_i32, %c0_i32_0 : i32, i32
  }
  func.func @transform_4(%arg0: i32) -> (i32, i32) {
    %c0_i32 = arith.constant 0 : i32
    %c0_i32_0 = arith.constant 0 : i32
    %c0_i32_1 = arith.constant 0 : i32
    return %c0_i32, %c0_i32_0 : i32, i32
  }
  func.func @transform_5(%arg0: i32) -> (i32, i32, i32) {
    %c0_i32 = arith.constant 0 : i32
    %c0_i32_0 = arith.constant 0 : i32
    %c0_i32_1 = arith.constant 0 : i32
    return %arg0, %c0_i32, %c0_i32_0 : i32, i32, i32
  }
}

</mosaic_0001>

<bundles_post_ra>
// kernel: tpu_custom_call.1
= control target key start
LH: loop header
LB: loop body
LE: loop exit
PB: predicated region body
PF: predicated region fallthrough
CT: control target
= control target key end

     0   :  { %10 = vsyncpa [#allocation3], 0  ;;  %s1434_s0 = inlined_call_operand.hbm [shape: f32[2,16,128], index: 0, kind: input, shape index: {}]   ;;  %s1435_s1 = inlined_call_operand.vmem [shape: bf16[32,16], index: 1, kind: input, shape index: {}]   ;;  %s1436_s2 = inlined_call_operand.vmem [shape: bf16[128,128], index: 2, kind: input, shape index: {}]   ;;  %s1437_s3 = inlined_call_operand.vmem [shape: bf16[64,32], index: 3, kind: input, shape index: {}]   ;;  %s1438_s4 = inlined_call_operand.hbm [shape: bf16[128,128], index: 4, kind: input, shape index: {}]   ;;  %s1439_s5 = inlined_call_operand.hbm [shape: f32[2,64,128], index: 5, kind: output, shape index: {}]  }
   0x1   :  { %12 = vsyncpa [#allocation3 + $0x1], 0 }
   0x2   :  { %13 = vsyncpa [#allocation6], 0 }
   0x3   :  { %14 = vsyncpa [#allocation4], 0 }
   0x4   :  { %16 = vsyncpa [#allocation4 + $0x1], 0  ;;  %s1186_s18 = smov 0   ;;  %s1188_s19 = smov 0  }
   0x5   :  { %s1190_s20 = smov 0   ;;  %s1192_s21 = smov 0  }
   0x6 LB: > { %s1207_s22 = sadd.s32 4294967295, %s1145_s21   ;;  %s793_s23 = sadd.s32 4294967294, %s1145_s21   ;;  %s1145_s21 = sphi %s1192_s21, %s1459_s21   ;;  %s1141_s20 = sphi %s1190_s20, %s1458_s20   ;;  %s1137_s19 = sphi %s1188_s19, %s1457_s19   ;;  %s1133_s18 = sphi %s1186_s18, %s1456_s18  }
   0x7   : > { %p42_p0 = scmp.ne.s32.totalorder %s1137_s19, %s1133_s18  ;;  %p1440_p1 = scmp.eq.s32.totalorder %s1207_s22, 0 }
   0x8   : > { %p156_p3 = scmp.eq.s32.totalorder %s793_s23, 1  ;;  %p794_p5 = scmp.ge.s32.totalorder %s1145_s21, 1 }
   0x9   : > { %p1216_p4 = por %p1440_p1, %p42_p0  ;;  %p163_p7 = scmp.lt.s32.totalorder %s1145_s21, 3 }
   0xa   : > { %p1221_p6 = por %p156_p3, %p42_p0  ;;  %s1147_s27 = smov [#allocation5]  }
   0xb   : > { %s1443_s24 = scalar_select %p1216_p4, 1, 0 }
   0xc   : > { %s1444_s25 = scalar_select %p1221_p6, 1, 0 }
   0xd   : > { %p1226_p8 = pnand %p794_p5, %p163_p7  ;;  %s184_s28 = sshll.u32 %s1147_s27, 4  ;;  %s1230_s28 = int_to_ptr.vmem [resolvable:$true] %s184_s28 }
   0xe   : > { %s1242_s30 = sadd.s32 1, %s1145_s21   ;;  %s29_s6 = sadd.s32 1, %s1141_s20 }
   0xf   : > { %s1445_s26 = scalar_select %p1226_p8, 1, 0 }
  0x10   : > { %p940_p9 = pneg %p1226_p8  ;;  %s26_s7 = ssub.s32 %s1145_s21, %s1242_s30 }
  0x11   : > { %s1017_s10 = scalar_lea.hbm %s1438_s4, 1024 }
  0x12   : > { %p1237_p11 = pnand %p940_p9, %p1440_p1  ;;  %p1018_p12 = scmp.ne.s32.totalorder %s1438_s4, %s1017_s10 }
  0x13   : > { %p1024_p5 = scmp.lt.u32.totalorder %s1017_s10, %s1438_s4 }
  0x14   : > { %p1019_p13 = pneg %p1237_p11 }
  0x16   : > { %p1020_p0 = pnand %p1019_p13, %p1018_p12 }
  0x18   : > { %p1021_p3 = pneg %p1020_p0 }
  0x1a   : > { %p1026_p7 = pnand %p1024_p5, %p1021_p3 }
  0x1c   : > { %1029 = shalt.err (!%p1026_p7)
}
  0x1d   : > { %s1030_s15 = scalar_lea.vmem %s1230_s28, 1024  ;;  %p1038_p2 = scmp.lt.s32.totalorder %s1230_s28, %s1230_s28 }
  0x1e   : > { %p1031_p9 = scmp.ne.s32.totalorder %s1230_s28, %s1030_s15  ;;  %p1039_p6 = scmp.lt.s32.totalorder %s1030_s15, %s1030_s15 }
  0x20   : > { %p1033_p10 = pnand %p1031_p9, %p1019_p13  ;;  %p1040_p4 = por %p1039_p6, %p1038_p2 }
  0x22   : > { %p1034_p1 = pneg %p1033_p10 }
  0x24   : > { %p1041_p8 = pnand %p1040_p4, %p1034_p1 }
  0x26   : > { %1044 = shalt.err (!%p1041_p8)
}
  0x27   : > { %s1148_s16 = smov 64   ;;  %s1149_s17 = smov 4  }
  0x28   : > { %943 = dma.hbm_to_vmem [thread:$0]  (!%p1237_p11), %s1438_s4, 1024, %s1230_s28, [#allocation6], %s1148_s16, %s1148_s16, %s1149_s17  }
  0x29   : > { %p27_p2 = scmp.eq.s32.totalorder %s26_s7, 0  ;;  %p36_p1 = scmp.ne.s32.totalorder %s1141_s20, %s1137_s19 }
  0x2a   : > { %p37_p4 = scmp.eq.s32.totalorder %s1145_s21, 0  ;;  %p953_p6 = scmp.lt.s32.totalorder %s1145_s21, 2 }
  0x2b   : > { %s1273_s8 = scalar_select %p27_p2, %s1141_s20, %s29_s6  }
  0x2c   : > { %p38_p8 = por %p37_p4, %p36_p1  ;;  %p1447_p10 = scmp.eq.s32.totalorder %s1207_s22, 1 }
  0x2d   : > { %s198_s10 = sand.u32 1, %s1141_s20   ;;  %s837_s11 = sshll.u32 %s1145_s21, 8 }
  0x2e   : > { %p1277_p12 = por %p1447_p10, %p36_p1  ;;  %s797_s12 = sshll.u32 %s198_s10, 4 }
  0x2f   : > { %s1286_s14 = scalar_lea.hbm %s1434_s0, %s837_s11  ;;  %s202_s28 = scalar_lea.vmem [#allocation2], %s797_s12 }
  0x30   : > { %s209_s6 = sshll.u32 %s202_s28, 4  ;;  %p1288_p11 = pnand %p953_p6, %p38_p8  ;;  %s1292_s6 = int_to_ptr.vmem [resolvable:$true] %s209_s6 }
  0x31   : > { %s1294_s15 = scalar_lea.sflag [#allocation3], %s198_s10  ;;  %s1045_s16 = scalar_lea.hbm %s1286_s14, 256 }
  0x32   : > { %p1046_p13 = scmp.ne.s32.totalorder %s1286_s14, %s1045_s16  ;;  %p1047_p0 = pneg %p1288_p11 }
  0x33   : > { %s1050_s27 = scalar_lea.hbm %s1434_s0, 512  ;;  %p1051_p7 = scmp.lt.u32.totalorder %s1286_s14, %s1434_s0 }
  0x34   : > { %p1048_p3 = pnand %p1047_p0, %p1046_p13  ;;  %p1052_p9 = scmp.lt.u32.totalorder %s1050_s27, %s1045_s16 }
  0x35   : > { %p1054_p1 = scmp.lt.u32.totalorder %s1045_s16, %s1286_s14 }
  0x36   : > { %p1049_p5 = pneg %p1048_p3  ;;  %p1053_p2 = por %p1052_p9, %p1051_p7 }
  0x38   : > { %p1055_p4 = por %p1054_p1, %p1053_p2 }
  0x3a   : > { %p1056_p6 = pnand %p1055_p4, %p1049_p5 }
  0x3c   : > { %1059 = shalt.err (!%p1056_p6)
}
  0x3d   : > { %s1060_s10 = scalar_lea.vmem %s1292_s6, 256  ;;  %s1150_s29 = smov [#allocation2]  }
  0x3e   : > { %p1061_p8 = scmp.ne.s32.totalorder %s1292_s6, %s1060_s10  ;;  %s1065_s13 = sshll.u32 %s1150_s29, 4  ;;  %s1066_s13 = int_to_ptr.vmem [resolvable:$false] %s1065_s13 }
  0x3f   : > { %s1067_s28 = scalar_lea.vmem %s1066_s13, 512  ;;  %p1068_p3 = scmp.lt.s32.totalorder %s1292_s6, %s1066_s13 }
  0x40   : > { %p1063_p10 = pnand %p1061_p8, %p1047_p0  ;;  %p1069_p7 = scmp.lt.s32.totalorder %s1067_s28, %s1060_s10 }
  0x42   : > { %p1064_p13 = pneg %p1063_p10  ;;  %p1070_p9 = por %p1069_p7, %p1068_p3 }
  0x44   : > { %p1071_p2 = pnand %p1070_p9, %p1064_p13 }
  0x46   : > { %1074 = shalt.err (!%p1071_p2)
}
  0x47   : > { %s1151_s16 = smov 128   ;;  %s1152_s17 = smov 8  }
  0x48   : > { %947 = dma.hbm_to_vmem [thread:$0]  (!%p1288_p11), %s1286_s14, 256, %s1292_s6, %s1294_s15, %s1151_s16, %s1151_s16, %s1152_s17  }
  0x49   : > { %p1450_p0 = scmp.ne.s32.totalorder %s1445_s26, 0 }
  0x4a   : > { %s1325_s23 = sand.u32 (!%p1450_p0), 1, %s1137_s19   ;;  %p1451_p5 = scmp.ne.s32.totalorder (!%p1450_p0), %s1443_s24, 0 }
  0x4b   : > { %221 = sbr.rel (%p1450_p0) target bundleno = 992 (0x3e0), region = 40  ;;  %s801_s27 = sshll.u32 (!%p1450_p0), %s1325_s23, 4 }
  0x4c   : > { %s224_s11 = scalar_lea.sflag (!%p1450_p0), [#allocation3], %s1325_s23  ;;  %s227_s12 = scalar_lea.vmem (!%p1450_p0), [#allocation2], %s801_s27 }
  0x52   : > { %1120 = dma.done.wait (%p1451_p5), %s224_s11, 256  }
  0x53   : > { %1122 = vsyncadd (%p1451_p5), %s224_s11, 4294967040  ;;  %p1452_p1 = scmp.eq.s32.totalorder %s1207_s22, 0 }
  0x55   : > { %1124 = dma.done.wait (%p1452_p1), [#allocation6], 1024   ;;  %p1453_p11 = pmov %p1452_p1 }
  0x56   : > { %v259_v0 = vld [vmem:[%s227_s12] sm:$0xff]  ;;  %v260_v1 = vld [vmem:[%s227_s12 + $0x8] sm:$0xff]  ;;  %vm292_vm0 = vcmask 130048   ;;  %vm493_vm1 = vcmask 261120   ;;  %s803_s11 = sshll.u32 %s1325_s23, 6  ;;  %s838_s14 = sshll.u32 %s1207_s22, 10 }
  0x57   : > { %1126 = vsyncadd (%p1453_p11), [#allocation6], 4294966272  ;;  %v261_v2 = vpack.c.bf16 %v260_v1, %v259_v0  ;;  %v995_v3 = vld [vmem:[%s1435_s1] sm:$0xff]   ;;  %v996_v4 = vld [vmem:[%s1435_s1 + $0x8] sm:$0xff]   ;;  %s257_s12 = scalar_lea.vmem [#allocation7], %s803_s11  ;;  %s1390_s24 = scalar_lea.hbm %s1439_s5, %s838_s14 }
  0x58   : > { %872 = vmatprep.mubr.msk.bf16.mxu1 %vm292_vm0, %v995_v3  ;;  %v997_v5 = vld [vmem:[%s1436_s2] sm:$0xff]   ;;  %v998_v6 = vld [vmem:[%s1436_s2 + $0x8] sm:$0xff]   ;;  %v999_v7 = vld [vmem:[%s1436_s2 + $0x10] sm:$0xff]   ;;  %s710_s26 = sshll.u32 %s257_s12, 4  ;;  %s697_s15 = scalar_lea.sflag [#allocation4], %s1325_s23  ;;  %s1385_s26 = int_to_ptr.vmem [resolvable:$true] %s710_s26 }
  0x59   : > { %870 = vmatprep.subr.bf16.mxu1 %v261_v2  ;;  %v1000_v8 = vld [vmem:[%s1436_s2 + $0x18] sm:$0xff]   ;;  %v1001_v9 = vld [vmem:[%s1436_s2 + $0x20] sm:$0xff]   ;;  %v1002_v10 = vld [vmem:[%s1436_s2 + $0x28] sm:$0xff]   ;;  %s1075_s22 = scalar_lea.vmem %s1385_s26, 1024  ;;  %s1153_s10 = smov [#allocation7]  }
  0x5a   : > { %871 = vmatpush3.bf16.msra.mxu1 %v261_v2  ;;  %v1003_v11 = vld [vmem:[%s1436_s2 + $0x30] sm:$0xff]   ;;  %v1004_v12 = vld [vmem:[%s1436_s2 + $0x38] sm:$0xff]   ;;  %v1005_v19 = vld [vmem:[%s1437_s3] sm:$0xff]   ;;  %p1076_p4 = scmp.ne.s32.totalorder %s1385_s26, %s1075_s22  ;;  %s1079_s29 = sshll.u32 %s1153_s10, 4  ;;  %s1080_s29 = int_to_ptr.vmem [resolvable:$false] %s1079_s29 }
  0x5b   : > { %876 = vmatprep.subr.bf16.mxu1 %v997_v5  ;;  %900 = vmatprep.mubr.msk.bf16.mxu0 %vm493_vm1, %v1005_v19  ;;  %v1009_v26 = vld [vmem:[#allocation5] sm:$0xff]   ;;  %v1006_v27 = vld [vmem:[%s1437_s3 + $0x8] sm:$0xff]   ;;  %v1007_v28 = vld [vmem:[%s1437_s3 + $0x10] sm:$0xff]   ;;  %s1081_s13 = scalar_lea.vmem %s1080_s29, 2048  ;;  %p1082_p10 = scmp.lt.s32.totalorder %s1385_s26, %s1080_s29 }
  0x5c   : > { %v1010_v29 = vld [vmem:[#allocation5 + $0x8] sm:$0xff]   ;;  %v1011_v30 = vld [vmem:[#allocation5 + $0x10] sm:$0xff]   ;;  %v1008_v31 = vld [vmem:[%s1437_s3 + $0x18] sm:$0xff]   ;;  %p1077_p6 = pnand %p1076_p4, %p1277_p12  ;;  %p1083_p13 = scmp.lt.s32.totalorder %s1081_s13, %s1075_s22 }
  0x5d   : > { %873 = vmatmul.mubr.msk.bf16.vlgmr.msra.gmra.mrb[0].mxu1 %vm292_vm0, %v996_v4  ;;  %v1012_v32 = vld [vmem:[#allocation5 + $0x18] sm:$0xff]   ;;  %v1013_v33 = vld [vmem:[#allocation5 + $0x20] sm:$0xff]   ;;  %v1014_v34 = vld [vmem:[#allocation5 + $0x28] sm:$0xff]  }
  0x5e   : > { %877 = vmatpush3.bf16.msra.mxu1 %v997_v5  ;;  %v1015_v35 = vld [vmem:[#allocation5 + $0x30] sm:$0xff]   ;;  %v1016_v36 = vld [vmem:[#allocation5 + $0x38] sm:$0xff]   ;;  %p1078_p8 = pneg %p1077_p6  ;;  %p1084_p3 = por %p1083_p13, %p1082_p10 }
  0x5f   : > { %878 = vmatprep.subr.bf16.mxu1 %v998_v6 }
  0x60   : > { %p1085_p7 = pnand %p1084_p3, %p1078_p8 }
  0x62   : > { %879 = vmatpush3.bf16.msra.mxu1 %v998_v6 }
  0x63   : > { %880 = vmatprep.subr.bf16.mxu1 %v999_v7 }
  0x66   : > { %881 = vmatpush3.bf16.msra.mxu1 %v999_v7 }
  0x67   : > { %882 = vmatprep.subr.bf16.mxu1 %v1000_v8 }
  0x6a   : > { %883 = vmatpush3.bf16.msra.mxu1 %v1000_v8 }
  0x6b   : > { %884 = vmatprep.subr.bf16.mxu1 %v1001_v9 }
  0x6e   : > { %885 = vmatpush3.bf16.msra.mxu1 %v1001_v9 }
  0x6f   : > { %886 = vmatprep.subr.bf16.mxu1 %v1002_v10 }
  0x72   : > { %887 = vmatpush3.bf16.msra.mxu1 %v1002_v10 }
  0x73   : > { %888 = vmatprep.subr.bf16.mxu1 %v1003_v11 }
  0x76   : > { %889 = vmatpush3.bf16.msra.mxu1 %v1003_v11 }
  0x77   : > { %890 = vmatprep.subr.bf16.mxu1 %v1004_v12 }
  0x7a   : > { %891 = vmatpush3.bf16.msra.mxu1 %v1004_v12 }
 0x130   : > { %v874_v13 = vpop.f32.mrb[0].mxu1 }
 0x131   : > { %v333_v14 = vpop.f32.mrb[1].mxu1 }
 0x132   : > { %v875_v15 = vpop.f32.mrb[2].mxu1 }
 0x133   : > { %v349_v16 = vpack.c.bf16 %v875_v15, %v874_v13  ;;  %v336_v17 = vpop.f32.mrb[3].mxu1 }
 0x134   : > { %v348_v18 = vpack.c.bf16 %v336_v17, %v333_v14 }
 0x136   : > { %892 = vmatprep.mubr.bf16.mxu1 %v348_v18 }
 0x137   : > { %893 = vmatmul.mubr.bf16.vlgmr.msra.gmra.mrb[4].mxu1 %v349_v16 }
 0x20a   : > { %v894_v20 = vpop.f32.mrb[4].mxu1 }
 0x20b   : > { %v432_v21 = vpop.f32.mrb[5].mxu1 }
 0x20c   : > { %v895_v22 = vpop.f32.mrb[6].mxu1 }
 0x20d   : > { %v448_v23 = vpack.c.bf16 %v895_v22, %v894_v20  ;;  %v435_v24 = vpop.f32.mrb[7].mxu1 }
 0x20e   : > { %v447_v25 = vpack.c.bf16 %v435_v24, %v432_v21 }
 0x210   : > { %896 = vmatprep.subr.bf16.mxu0 %v447_v25 }
 0x211   : > { %897 = vmatpush3.bf16.msra.mxu0 %v447_v25 }
 0x212   : > { %898 = vmatprep.subr.bf16.mxu0 %v448_v23 }
 0x215   : > { %899 = vmatpush3.bf16.msra.mxu0 %v448_v23 }
 0x216   : > { %908 = vmatprep.subr.bf16.mxu0 %v1009_v26 }
 0x218   : > { %901 = vmatmul.mubr.msk.bf16.vlgmr.msra.gmra.mrb[0].mxu0 %vm493_vm1, %v1006_v27 }
 0x219   : > { %904 = vmatprep.mubr.msk.bf16.mxu0 %vm493_vm1, %v1007_v28  ;;  %909 = vmatpush3.bf16.msra.mxu0 %v1009_v26 }
 0x21a   : > { %910 = vmatprep.subr.bf16.mxu0 %v1010_v29 }
 0x21d   : > { %911 = vmatpush3.bf16.msra.mxu0 %v1010_v29 }
 0x21e   : > { %912 = vmatprep.subr.bf16.mxu0 %v1011_v30 }
 0x220   : > { %905 = vmatmul.mubr.msk.bf16.gmra.mrb[4].mxu0 %vm493_vm1, %v1008_v31 }
 0x221   : > { %913 = vmatpush3.bf16.msra.mxu0 %v1011_v30 }
 0x222   : > { %914 = vmatprep.subr.bf16.mxu0 %v1012_v32 }
 0x225   : > { %915 = vmatpush3.bf16.msra.mxu0 %v1012_v32 }
 0x226   : > { %916 = vmatprep.subr.bf16.mxu0 %v1013_v33 }
 0x229   : > { %917 = vmatpush3.bf16.msra.mxu0 %v1013_v33 }
 0x22a   : > { %918 = vmatprep.subr.bf16.mxu0 %v1014_v34 }
 0x22d   : > { %919 = vmatpush3.bf16.msra.mxu0 %v1014_v34 }
 0x22e   : > { %920 = vmatprep.subr.bf16.mxu0 %v1015_v35 }
 0x231   : > { %921 = vmatpush3.bf16.msra.mxu0 %v1015_v35 }
 0x232   : > { %922 = vmatprep.subr.bf16.mxu0 %v1016_v36 }
 0x235   : > { %923 = vmatpush3.bf16.msra.mxu0 %v1016_v36 }
 0x2eb   : > { %v902_v37 = vpop.f32.mrb[0].mxu0 }
 0x2ec   : > { %v540_v38 = vpop.f32.mrb[1].mxu0 }
 0x2ed   : > { %v903_v39 = vpop.f32.mrb[2].mxu0 }
 0x2ee   : > { %v572_v40 = vpack.c.bf16 %v903_v39, %v902_v37  ;;  %v543_v41 = vpop.f32.mrb[3].mxu0 }
 0x2ef   : > { %v571_v42 = vpack.c.bf16 %v543_v41, %v540_v38 }
 0x2f1   : > { %924 = vmatprep.mubr.bf16.mxu0 %v571_v42 }
 0x2f2   : > { %925 = vmatmul.mubr.bf16.vlgmr.msra.gmra.mrb[8].mxu0 %v572_v40 }
 0x2f3   : > { %v906_v43 = vpop.f32.mrb[4].mxu0 }
 0x2f4   : > { %v556_v44 = vpop.f32.mrb[5].mxu0 }
 0x2f5   : > { %v907_v45 = vpop.f32.mrb[6].mxu0 }
 0x2f6   : > { %v574_v46 = vpack.c.bf16 %v907_v45, %v906_v43  ;;  %v559_v47 = vpop.f32.mrb[7].mxu0 }
 0x2f7   : > { %v573_v48 = vpack.c.bf16 %v559_v47, %v556_v44 }
 0x2f9   : > { %928 = vmatprep.mubr.bf16.mxu0 %v573_v48 }
 0x2fa   : > { %929 = vmatmul.mubr.bf16.gmra.mrb[12].mxu0 %v574_v46 }
 0x3c5   : > { %v926_v49 = vpop.f32.mrb[8].mxu0 }
 0x3c6   : > { %690 = vst [vmem:[%s257_s12 + $0x10] sm:$0xff] %v926_v49  ;;  %v657_v50 = vpop.f32.mrb[9].mxu0 }
 0x3c7   : > { %688 = vst [vmem:[%s257_s12] sm:$0xff] %v657_v50  ;;  %v927_v51 = vpop.f32.mrb[10].mxu0 }
 0x3c8   : > { %691 = vst [vmem:[%s257_s12 + $0x18] sm:$0xff] %v927_v51  ;;  %v660_v52 = vpop.f32.mrb[11].mxu0 }
 0x3c9   : > { %689 = vst [vmem:[%s257_s12 + $0x8] sm:$0xff] %v660_v52 }
 0x3cd   : > { %v930_v53 = vpop.f32.mrb[12].mxu0 }
 0x3ce   : > { %694 = vst [vmem:[%s257_s12 + $0x30] sm:$0xff] %v930_v53  ;;  %v673_v54 = vpop.f32.mrb[13].mxu0 }
 0x3cf   : > { %692 = vst [vmem:[%s257_s12 + $0x20] sm:$0xff] %v673_v54  ;;  %v931_v55 = vpop.f32.mrb[14].mxu0 }
 0x3d0   : > { %695 = vst [vmem:[%s257_s12 + $0x38] sm:$0xff] %v931_v55  ;;  %v676_v56 = vpop.f32.mrb[15].mxu0 }
 0x3d1   : > { %693 = vst [vmem:[%s257_s12 + $0x28] sm:$0xff] %v676_v56 }
 0x3d2   : > { %1088 = shalt.err (!%p1085_p7)
}
 0x3d3   : > { %s1089_s28 = scalar_lea.hbm %s1390_s24, 1024  ;;  %s1093_s27 = scalar_lea.hbm %s1439_s5, 2048 }
 0x3d4   : > { %p1090_p9 = scmp.ne.s32.totalorder %s1390_s24, %s1089_s28  ;;  %p1094_p5 = scmp.lt.u32.totalorder %s1390_s24, %s1439_s5 }
 0x3d5   : > { %p1095_p1 = scmp.lt.u32.totalorder %s1093_s27, %s1089_s28  ;;  %p1097_p4 = scmp.lt.u32.totalorder %s1089_s28, %s1390_s24 }
 0x3d6   : > { %p1091_p2 = pnand %p1090_p9, %p1277_p12 }
 0x3d7   : > { %p1096_p11 = por %p1095_p1, %p1094_p5 }
 0x3d8   : > { %p1092_p0 = pneg %p1091_p2 }
 0x3d9   : > { %p1098_p6 = por %p1097_p4, %p1096_p11 }
 0x3db   : > { %p1099_p8 = pnand %p1098_p6, %p1092_p0 }
 0x3dd   : > { %1102 = shalt.err (!%p1099_p8)
}
 0x3de   : > { %s1154_s14 = smov 128   ;;  %s1155_s6 = smov 8  }
 0x3df   : > { %938 = dma.vmem_to_hbm [thread:$0]  (%p1277_p12), %s1385_s26, 1024, %s1390_s24, %s697_s15, %s1154_s14, %s1154_s14, %s1155_s6  }
 0x3e0 PF: > { %s725_s7 = sand.u32 1, %s1133_s18   ;;  %p1454_p10 = scmp.ne.s32.totalorder %s1444_s25, 0 }
 0x3e1   : > { %p1455_p13 = scmp.ge.s32.totalorder %s1145_s21, 2  ;;  %s726_s22 = scalar_lea.sflag [#allocation4], %s725_s7 }
 0x3e3   : > { %p949_p3 = pnand %p1455_p13, %p1454_p10 }
 0x3e5   : > { %1128 = dma.done.wait (!%p949_p3), %s726_s22, 1024  }
 0x3e6   : > { %1130 = vsyncadd (!%p949_p3), %s726_s22, 4294966272  ;;  %p19_p7 = scmp.ge.s32.totalorder %s1242_s30, 4   ;;  %s1456_s18 = smov %s1137_s19 }
 0x3e7   : > { %s1457_s19 = smov %s1141_s20  ;;  %s1458_s20 = smov %s1273_s8 }
 0x3e8   : > { %s1459_s21 = smov %s1242_s30  ;;  %21 = sbr.rel (!%p19_p7) target bundleno = 6 (0x6), region = 89 }
 0x3ef   :  { %731 = vsyncpa [#allocation3], 1 }
 0x3f0   :  { %733 = vsyncpa [#allocation3 + $0x1], 1 }
 0x3f1   :  { %734 = vsyncpa [#allocation6], 1 }
 0x3f2   :  { %735 = vsyncpa [#allocation4], 1 }
 0x3f3   :  { %737 = vsyncpa [#allocation4 + $0x1], 1 }

</bundles_post_ra>
